<compile_context>
chip_gen: v5e
topology: v5e:2x2
jax: 0.10.0
libtpu: 0.0.40
codegen_flags: <defaults>
</compile_context>

<pallas_src>
import jax
import jax.numpy as jnp
from jax.experimental import pallas as pl
from jax.experimental.pallas import tpu as pltpu

# ----------------------------- config (small synthetic sizes) ----------------------------
IN_CH = 3          # input image channels
F_DIM = 32         # encoder out_dim / code dim
IMNET_HIDDEN = 32  # imnet hidden width
IMNET_OUT = 3      # imnet output channels
KSIZE = 3          # encoder conv kernel size
_LANE = 128
_SUBLANE = 8


def _round_up(x, m):
    return ((x + m - 1) // m) * m


# ---------------------------------- Pallas kernel ----------------------------------------
def _fused_crl_kernel(patch_ref, wcm_ref, bcm_ref, w0s_ref, b0_ref, w1t_ref, b1_ref,
                      pred_ref, latent_ref):
    """Fused encoder-conv (as one matmul) + modal_trans + imnet per (batch, pixel-tile).

    patch_ref  : (1, Kp, TP)   tap-major im2col patches (Kp = 9*Cin padded to 32),
                               pixels lane-dense
    wcm_ref    : (1, C, Kp)    conv weights, rows pre-scaled by 1/code_src[b]
    bcm_ref    : (1, C, 1)     conv bias / code_src[b]
    w0s_ref    : (1, HID, C)   imnet layer-0 weight^T, columns pre-scaled by code_tgt[b]
    b0_ref     : (HID, 1)
    w1t_ref    : (OUT, HID)    imnet layer-1 weight^T
    b1_ref     : (OUT, 1)
    pred_ref   : (1, OUT, TP)  channel-major prediction tile (lane-dense store)
    latent_ref : (1, C, TP)    channel-major latent tile (lane-dense store)
    """
    patch = patch_ref[0]                                                    # (Kp, TP)

    # conv + (1/code_src) fold: latent_content in (C, TP) orientation, no transpose.
    latent = (jnp.dot(wcm_ref[0], patch, preferred_element_type=jnp.float32)
              + bcm_ref[0])                                                  # (C, TP)
    latent_ref[0] = latent

    # imnet on feat_tgt = latent * code_tgt, with code_tgt folded into w0.
    h = jnp.maximum(
        jnp.dot(w0s_ref[0], latent, preferred_element_type=jnp.float32) + b0_ref[...],
        0.0)                                                                 # (HID, TP)
    pred_ref[0] = (jnp.dot(w1t_ref[...], h, preferred_element_type=jnp.float32)
                   + b1_ref[...])                                            # (OUT, TP)


# ---------------------------------- wrapper (glue) ----------------------------------------
def _code_mlp(mlp_params, x):
    """codemapping_mlp: 3 -> F -> F -> F -> F -> F, ReLU after the first 4 layers."""
    h = x
    n = len(mlp_params)
    for i, (w, b) in enumerate(mlp_params):
        h = h @ w + b
        if i < n - 1:
            h = jnp.maximum(h, 0.0)
    return h


def crl_forward(params, img_src, cond_src, cond_tgt, *, max_tile_pixels=8192):
    """Full forward: (pred (B,3,H,W), content (B,F_DIM,H,W)) in NCHW like PyTorch."""
    B, Cin, H, W = img_src.shape
    n_pix = H * W
    # pixel tile: multiple of 128 lanes; with (32, TP) blocks the per-tile working set is
    # ~4 MiB even at TP=8192, far below the 32 MiB scoped VMEM limit on all generations.
    TP = min(_round_up(max_tile_pixels, _LANE), _round_up(n_pix, _LANE))
    n_pad = _round_up(n_pix, TP)
    T = n_pad // TP

    # --- tiny code MLP in plain XLA (dispatch-dominated; per the perf review) -------------
    code_src = _code_mlp(params['code_mlp'], cond_src)                      # (B, C)
    code_tgt = _code_mlp(params['code_mlp'], cond_tgt)                      # (B, C)
    inv_cs = 1.0 / code_src                                                 # (B, C)

    # --- wrapper-side im2col: tap-major patches, pixels lane-dense ------------------------
    K_real = KSIZE * KSIZE * Cin                                            # 27
    Kp = _round_up(K_real, _SUBLANE)                                        # 32
    xp = jnp.pad(img_src, ((0, 0), (0, 0), (1, 1), (1, 1)))                 # (B,Cin,H+2,W+2)
    taps = [xp[:, :, dy:dy + H, dx:dx + W]
            for dy in range(KSIZE) for dx in range(KSIZE)]                  # 9 x (B,Cin,H,W)
    patch = jnp.concatenate(taps, axis=1).reshape(B, K_real, n_pix)         # (B, 27, HW)
    patch = jnp.pad(patch, ((0, 0), (0, Kp - K_real), (0, n_pad - n_pix)))  # (B, Kp, n_pad)

    # --- per-batch folded weights (hoisted out of the kernel) ------------------------------
    # channel-major conv weights: Wcm[o, (dy*3+dx)*Cin + c] = enc_w[o, c, dy, dx]
    w_cm = jnp.transpose(params['enc_w'], (0, 2, 3, 1)).reshape(F_DIM, K_real)
    w_cm = jnp.pad(w_cm, ((0, 0), (0, Kp - K_real)))                        # (C, Kp)
    w_cm_b = w_cm[None] * inv_cs[:, :, None]                                # (B, C, Kp)
    b_cm_b = (params['enc_b'].reshape(1, F_DIM) * inv_cs)[:, :, None]       # (B, C, 1)

    (w0, b0), (w1, b1) = params['imnet']
    w0s_b = jnp.transpose(w0)[None] * code_tgt[:, None, :]                  # (B, HID, C)
    b0c = b0.reshape(IMNET_HIDDEN, 1)
    w1t = jnp.transpose(w1)                                                 # (OUT, HID)
    b1c = b1.reshape(IMNET_OUT, 1)

    pred_cm, latent_cm = pl.pallas_call(
        _fused_crl_kernel,
        out_shape=(jax.ShapeDtypeStruct((B, IMNET_OUT, n_pad), jnp.float32),
                   jax.ShapeDtypeStruct((B, F_DIM, n_pad), jnp.float32)),
        grid=(B, T),
        in_specs=[
            pl.BlockSpec((1, Kp, TP), lambda b, t: (b, 0, t)),
            pl.BlockSpec((1, F_DIM, Kp), lambda b, t: (b, 0, 0)),
            pl.BlockSpec((1, F_DIM, 1), lambda b, t: (b, 0, 0)),
            pl.BlockSpec((1, IMNET_HIDDEN, F_DIM), lambda b, t: (b, 0, 0)),
            pl.BlockSpec((IMNET_HIDDEN, 1), lambda b, t: (0, 0)),
            pl.BlockSpec((IMNET_OUT, IMNET_HIDDEN), lambda b, t: (0, 0)),
            pl.BlockSpec((IMNET_OUT, 1), lambda b, t: (0, 0)),
        ],
        out_specs=(pl.BlockSpec((1, IMNET_OUT, TP), lambda b, t: (b, 0, t)),
                   pl.BlockSpec((1, F_DIM, TP), lambda b, t: (b, 0, t))),
        compiler_params=pltpu.CompilerParams(
            dimension_semantics=("parallel", "arbitrary"),
            vmem_limit_bytes=32 * 1024 * 1024),
    )(patch, w_cm_b, b_cm_b, w0s_b, b0c, w1t, b1c)

    # trailing slice is a no-op when n_pad == n_pix; outputs are already channel-major.
    pred = pred_cm[:, :, :n_pix].reshape(B, IMNET_OUT, H, W)
    content = latent_cm[:, :, :n_pix].reshape(B, F_DIM, H, W)
    return pred, content
# TODO(synk): CrossAttention branch of modal_trans (cross_attn=True) is not reached by
# forward() (default is False) and is not implemented here.


# --------------------------------- param init (deterministic) -----------------------------
def init_params(key):
    ks = jax.random.split(key, 16)
    scale = 0.1
    params = {}
    # encoder conv: (Cout, Cin, 3, 3) PyTorch OIHW convention
    params['enc_w'] = scale * jax.random.normal(ks[0], (F_DIM, IN_CH, KSIZE, KSIZE),
                                                jnp.float32)
    params['enc_b'] = scale * jax.random.normal(ks[1], (1, F_DIM), jnp.float32)
    # codemapping_mlp: 3 -> F -> F -> F -> F -> F
    dims = [3, F_DIM, F_DIM, F_DIM, F_DIM, F_DIM]
    mlp = []
    for li in range(5):
        w = scale * jax.random.normal(ks[2 + li], (dims[li], dims[li + 1]), jnp.float32)
        if li == 4:
            # keep final code values away from zero (feat is divided by code_src)
            b = jnp.ones((1, dims[li + 1]), jnp.float32)
        else:
            b = scale * jax.random.normal(ks[8 + li], (1, dims[li + 1]), jnp.float32)
        mlp.append((w, b))
    params['code_mlp'] = tuple(mlp)
    # imnet: F_DIM -> IMNET_HIDDEN -> IMNET_OUT
    params['imnet'] = (
        (scale * jax.random.normal(ks[13], (F_DIM, IMNET_HIDDEN), jnp.float32),
         scale * jax.random.normal(ks[14], (1, IMNET_HIDDEN), jnp.float32)),
        (scale * jax.random.normal(ks[15], (IMNET_HIDDEN, IMNET_OUT), jnp.float32),
         jnp.zeros((1, IMNET_OUT), jnp.float32)),
    )
    return params


# --------------------------------- pure-JAX reference -------------------------------------
def _reference_forward(params, img_src, cond_src, cond_tgt):
    feat = jax.lax.conv_general_dilated(
        img_src, params['enc_w'], window_strides=(1, 1), padding=((1, 1), (1, 1)),
        dimension_numbers=('NCHW', 'OIHW', 'NCHW'))
    feat = feat + params['enc_b'].reshape(1, F_DIM, 1, 1)

    code_src = _code_mlp(params['code_mlp'], cond_src)
    code_tgt = _code_mlp(params['code_mlp'], cond_tgt)
    latent = feat / code_src[:, :, None, None]
    feat_tgt = latent * code_tgt[:, :, None, None]
    (w0, b0), (w1, b1) = params['imnet']
    x = jnp.transpose(feat_tgt, (0, 2, 3, 1))
    h = jnp.maximum(x @ w0 + b0, 0.0)
    pred = jnp.transpose(h @ w1 + b1, (0, 3, 1, 2))
    return pred, latent


# ------------------------------------------ main ------------------------------------------
if __name__ == "__main__":
    key = jax.random.PRNGKey(0)
    k_img, k_cs, k_ct, k_par = jax.random.split(key, 4)

    B, H, W = 2, 16, 16
    img_src = jax.random.normal(k_img, (B, IN_CH, H, W), jnp.float32)
    cond_src = jax.random.normal(k_cs, (B, 3), jnp.float32)
    cond_tgt = jax.random.normal(k_ct, (B, 3), jnp.float32)

    params = init_params(k_par)

    pred, content = jax.jit(crl_forward)(params, img_src, cond_src, cond_tgt)
    jax.block_until_ready((pred, content))

    assert pred.shape == (B, IMNET_OUT, H, W)
    assert content.shape == (B, F_DIM, H, W)

    ref_pred, ref_content = _reference_forward(params, img_src, cond_src, cond_tgt)
    assert jnp.allclose(pred, ref_pred, rtol=2e-4, atol=2e-4), \
        float(jnp.max(jnp.abs(pred - ref_pred)))
    assert jnp.allclose(content, ref_content, rtol=2e-4, atol=2e-4), \
        float(jnp.max(jnp.abs(content - ref_content)))

    print("KERNEL_OK")
</pallas_src>

<mosaic_0001>
module attributes {stable_mosaic.version = 11 : i64} {
  func.func @_fused_crl_kernel(%arg0: i32, %arg1: i32, %arg2: memref<1x32x256xf32, #tpu.memory_space<vmem>>, %arg3: memref<1x32x32xf32, #tpu.memory_space<vmem>>, %arg4: memref<1x32x1xf32, #tpu.memory_space<vmem>>, %arg5: memref<1x32x32xf32, #tpu.memory_space<vmem>>, %arg6: memref<32x1xf32, #tpu.memory_space<vmem>>, %arg7: memref<3x32xf32, #tpu.memory_space<vmem>>, %arg8: memref<3x1xf32, #tpu.memory_space<vmem>>, %arg9: memref<1x3x256xf32, #tpu.memory_space<vmem>>, %arg10: memref<1x32x256xf32, #tpu.memory_space<vmem>>) attributes {dimension_semantics = [#tpu.dimension_semantics<parallel>, #tpu.dimension_semantics<arbitrary>], iteration_bounds = array<i64: 2, 1>, scalar_prefetch = 0 : i64, scratch_operands = 0 : i64, tpu.core_type = #tpu.core_type<tc>, window_params = [{transform_indices = @transform_0, window_bounds = array<i64: 1, 32, 256>}, {transform_indices = @transform_1, window_bounds = array<i64: 1, 32, 32>}, {transform_indices = @transform_2, window_bounds = array<i64: 1, 32, 1>}, {transform_indices = @transform_3, window_bounds = array<i64: 1, 32, 32>}, {pipeline_mode = #tpu.pipeline_mode<synchronous>, transform_indices = @transform_4, window_bounds = array<i64: 32, 1>}, {pipeline_mode = #tpu.pipeline_mode<synchronous>, transform_indices = @transform_5, window_bounds = array<i64: 3, 32>}, {pipeline_mode = #tpu.pipeline_mode<synchronous>, transform_indices = @transform_6, window_bounds = array<i64: 3, 1>}, {transform_indices = @transform_7, window_bounds = array<i64: 1, 3, 256>}, {transform_indices = @transform_8, window_bounds = array<i64: 1, 32, 256>}]} {
    %c0 = arith.constant 0 : index
    %c0_0 = arith.constant 0 : index
    %c0_1 = arith.constant 0 : index
    %0 = vector.load %arg2[%c0, %c0_0, %c0_1] : memref<1x32x256xf32, #tpu.memory_space<vmem>>, vector<1x32x256xf32>
    %1 = vector.shape_cast %0 : vector<1x32x256xf32> to vector<32x256xf32>
    %c0_2 = arith.constant 0 : index
    %c0_3 = arith.constant 0 : index
    %c0_4 = arith.constant 0 : index
    %2 = vector.load %arg3[%c0_2, %c0_3, %c0_4] : memref<1x32x32xf32, #tpu.memory_space<vmem>>, vector<1x32x32xf32>
    %3 = vector.shape_cast %2 : vector<1x32x32xf32> to vector<32x32xf32>
    %cst = arith.constant dense<0.000000e+00> : vector<32x256xf32>
    %4 = tpu.matmul %3, %1, %cst {dimension_numbers = #tpu.dot_dimension_numbers<[1], [0], [0], [1], [0, 0, 1, 1], [], []>} : vector<32x32xf32>, vector<32x256xf32>, vector<32x256xf32> -> vector<32x256xf32>
    %c0_5 = arith.constant 0 : index
    %c0_6 = arith.constant 0 : index
    %c0_7 = arith.constant 0 : index
    %5 = vector.load %arg4[%c0_5, %c0_6, %c0_7] : memref<1x32x1xf32, #tpu.memory_space<vmem>>, vector<1x32x1xf32>
    %6 = vector.shape_cast %5 : vector<1x32x1xf32> to vector<32x1xf32>
    %7 = vector.broadcast %6 : vector<32x1xf32> to vector<32x256xf32>
    %8 = arith.addf %4, %7 : vector<32x256xf32>
    %c0_8 = arith.constant 0 : index
    %c0_9 = arith.constant 0 : index
    %c0_10 = arith.constant 0 : index
    %9 = vector.load %arg10[%c0_8, %c0_9, %c0_10] : memref<1x32x256xf32, #tpu.memory_space<vmem>>, vector<1x32x256xf32>
    %10 = vector.shape_cast %9 : vector<1x32x256xf32> to vector<32x256xf32>
    %11 = vector.shape_cast %8 : vector<32x256xf32> to vector<1x32x256xf32>
    tpu.vector_store %arg10[%c0_8, %c0_9, %c0_10], %11 {strides = array<i32>} : memref<1x32x256xf32, #tpu.memory_space<vmem>>, vector<1x32x256xf32>,
    %c0_11 = arith.constant 0 : index
    %c0_12 = arith.constant 0 : index
    %c0_13 = arith.constant 0 : index
    %12 = vector.load %arg5[%c0_11, %c0_12, %c0_13] : memref<1x32x32xf32, #tpu.memory_space<vmem>>, vector<1x32x32xf32>
    %13 = vector.shape_cast %12 : vector<1x32x32xf32> to vector<32x32xf32>
    %cst_14 = arith.constant dense<0.000000e+00> : vector<32x256xf32>
    %14 = tpu.matmul %13, %8, %cst_14 {dimension_numbers = #tpu.dot_dimension_numbers<[1], [0], [0], [1], [0, 0, 1, 1], [], []>} : vector<32x32xf32>, vector<32x256xf32>, vector<32x256xf32> -> vector<32x256xf32>
    %c0_15 = arith.constant 0 : index
    %c0_16 = arith.constant 0 : index
    %15 = vector.load %arg6[%c0_15, %c0_16] : memref<32x1xf32, #tpu.memory_space<vmem>>, vector<32x1xf32>
    %16 = vector.broadcast %15 : vector<32x1xf32> to vector<32x256xf32>
    %17 = arith.addf %14, %16 : vector<32x256xf32>
    %cst_17 = arith.constant 0.000000e+00 : f32
    %18 = vector.broadcast %cst_17 : f32 to vector<32x256xf32>
    %19 = arith.maximumf %17, %18 : vector<32x256xf32>
    %c0_18 = arith.constant 0 : index
    %c0_19 = arith.constant 0 : index
    %20 = vector.load %arg7[%c0_18, %c0_19] : memref<3x32xf32, #tpu.memory_space<vmem>>, vector<3x32xf32>
    %cst_20 = arith.constant dense<0.000000e+00> : vector<3x256xf32>
    %21 = tpu.matmul %20, %19, %cst_20 {dimension_numbers = #tpu.dot_dimension_numbers<[1], [0], [0], [1], [0, 0, 1, 1], [], []>} : vector<3x32xf32>, vector<32x256xf32>, vector<3x256xf32> -> vector<3x256xf32>
    %c0_21 = arith.constant 0 : index
    %c0_22 = arith.constant 0 : index
    %22 = vector.load %arg8[%c0_21, %c0_22] : memref<3x1xf32, #tpu.memory_space<vmem>>, vector<3x1xf32>
    %23 = vector.broadcast %22 : vector<3x1xf32> to vector<3x256xf32>
    %24 = arith.addf %21, %23 : vector<3x256xf32>
    %c0_23 = arith.constant 0 : index
    %c0_24 = arith.constant 0 : index
    %c0_25 = arith.constant 0 : index
    %25 = vector.load %arg9[%c0_23, %c0_24, %c0_25] : memref<1x3x256xf32, #tpu.memory_space<vmem>>, vector<1x3x256xf32>
    %26 = vector.shape_cast %25 : vector<1x3x256xf32> to vector<3x256xf32>
    %27 = vector.shape_cast %24 : vector<3x256xf32> to vector<1x3x256xf32>
    tpu.vector_store %arg9[%c0_23, %c0_24, %c0_25], %27 {strides = array<i32>} : memref<1x3x256xf32, #tpu.memory_space<vmem>>, vector<1x3x256xf32>,
    return
  }
  func.func @transform_0(%arg0: i32, %arg1: i32) -> (i32, i32, i32) {
    %c0_i32 = arith.constant 0 : i32
    %c0_i32_0 = arith.constant 0 : i32
    return %arg0, %c0_i32, %arg1 : i32, i32, i32
  }
  func.func @transform_1(%arg0: i32, %arg1: i32) -> (i32, i32, i32) {
    %c0_i32 = arith.constant 0 : i32
    %c0_i32_0 = arith.constant 0 : i32
    %c0_i32_1 = arith.constant 0 : i32
    return %arg0, %c0_i32, %c0_i32_0 : i32, i32, i32
  }
  func.func @transform_2(%arg0: i32, %arg1: i32) -> (i32, i32, i32) {
    %c0_i32 = arith.constant 0 : i32
    %c0_i32_0 = arith.constant 0 : i32
    %c0_i32_1 = arith.constant 0 : i32
    return %arg0, %c0_i32, %c0_i32_0 : i32, i32, i32
  }
  func.func @transform_3(%arg0: i32, %arg1: i32) -> (i32, i32, i32) {
    %c0_i32 = arith.constant 0 : i32
    %c0_i32_0 = arith.constant 0 : i32
    %c0_i32_1 = arith.constant 0 : i32
    return %arg0, %c0_i32, %c0_i32_0 : i32, i32, i32
  }
  func.func @transform_4(%arg0: i32, %arg1: i32) -> (i32, i32) {
    %c0_i32 = arith.constant 0 : i32
    %c0_i32_0 = arith.constant 0 : i32
    %c0_i32_1 = arith.constant 0 : i32
    return %c0_i32, %c0_i32_0 : i32, i32
  }
  func.func @transform_5(%arg0: i32, %arg1: i32) -> (i32, i32) {
    %c0_i32 = arith.constant 0 : i32
    %c0_i32_0 = arith.constant 0 : i32
    %c0_i32_1 = arith.constant 0 : i32
    return %c0_i32, %c0_i32_0 : i32, i32
  }
  func.func @transform_6(%arg0: i32, %arg1: i32) -> (i32, i32) {
    %c0_i32 = arith.constant 0 : i32
    %c0_i32_0 = arith.constant 0 : i32
    %c0_i32_1 = arith.constant 0 : i32
    return %c0_i32, %c0_i32_0 : i32, i32
  }
  func.func @transform_7(%arg0: i32, %arg1: i32) -> (i32, i32, i32) {
    %c0_i32 = arith.constant 0 : i32
    %c0_i32_0 = arith.constant 0 : i32
    return %arg0, %c0_i32, %arg1 : i32, i32, i32
  }
  func.func @transform_8(%arg0: i32, %arg1: i32) -> (i32, i32, i32) {
    %c0_i32 = arith.constant 0 : i32
    %c0_i32_0 = arith.constant 0 : i32
    return %arg0, %c0_i32, %arg1 : i32, i32, i32
  }
}

</mosaic_0001>

<bundles_post_ra>
// kernel: crl_forward.1
= control target key start
LH: loop header
LB: loop body
LE: loop exit
PB: predicated region body
PF: predicated region fallthrough
CT: control target
= control target key end

     0   :  { %s1021_s27 = smov 0   ;;  %s1023_s28 = smov 0   ;;  %s1122_s0 = inlined_call_operand.vmem [shape: f32[2,32,256], index: 0, kind: input, shape index: {}]   ;;  %s1123_s1 = inlined_call_operand.vmem [shape: f32[2,32,32], index: 1, kind: input, shape index: {}]   ;;  %s1124_s2 = inlined_call_operand.vmem [shape: f32[2,32,1], index: 2, kind: input, shape index: {}]   ;;  %s1125_s3 = inlined_call_operand.vmem [shape: f32[2,32,32], index: 3, kind: input, shape index: {}]   ;;  %s1126_s4 = inlined_call_operand.vmem [shape: f32[32,1], index: 4, kind: input, shape index: {}]   ;;  %s1127_s5 = inlined_call_operand.vmem [shape: f32[3,32], index: 5, kind: input, shape index: {}]   ;;  %s1128_s6 = inlined_call_operand.vmem [shape: f32[3,1], index: 6, kind: input, shape index: {}]   ;;  %s1129_s7 = inlined_call_operand.vmem [shape: f32[2,3,256], index: 7, kind: output, shape index: {0}]   ;;  %s1130_s8 = inlined_call_operand.vmem [shape: f32[2,32,256], index: 8, kind: output, shape index: {1}]  }
   0x1   :  { %s1025_s29 = smov 0  }
   0x2 LB: > { %s31_s30 = sadd.s32 1, %s969_s28  ;;  %p884_p0 = scmp.ge.s32.totalorder %s973_s29, 1  ;;  %s973_s29 = sphi %s1025_s29, %s19_s29   ;;  %s969_s28 = sphi %s1023_s28, %s1132_s28   ;;  %s965_s27 = sphi %s1021_s27, %s1131_s27  }
   0x3   : > { %p33_p1 = scmp.ge.s32.totalorder %s31_s30, 2  ;;  %p318_p2 = scmp.lt.s32.totalorder %s973_s29, 3 }
   0x5   : > { %s1134_s30 = smov (%p33_p1, %s31_s30), 0  ;;  %p319_p3 = pnand %p884_p0, %p318_p2 }
   0x6   : > { %p385_p4 = scmp.lt.s32.totalorder (!%p319_p3), %s965_s27, 1 }
   0x7   : > { %322 = sbr.rel (%p319_p3) target bundleno = 481 (0x1e1), region = 48 }
   0xc   : > { %v975_v0 = vmov 0   ;;  %s1136_s27 = smov (!%p385_p4, %s965_s27), 1  ;;  %vm465_vm0 = vcmask 261120   ;;  %v548_v15 = vld [vmem:[%s1126_s4] sm:$0xff]  ;;  %v549_v16 = vld [vmem:[%s1126_s4 + $0x8] sm:$0xff]  ;;  %v551_v39 = vld [vmem:[%s1126_s4 + $0x18] sm:$0xff] }
   0xd   : > { %949 = vset.pattern.permute.xlu1 %v975_v0  ;;  %948 = vset.pattern.permute.xlu0 %v975_v0  ;;  %s917_s9 = sshll.u32 %s1136_s27, 6  ;;  %s1048_s13 = sshll.u32 %s1136_s27, 5  ;;  %v550_v41 = vld [vmem:[%s1126_s4 + $0x10] sm:$0xff]  ;;  %v651_v43 = vld [vmem:[%s1128_s6] sm:$0x7]  ;;  %vm703_vm1 = vcmask 1043456  }
   0xe   : > { %950 = vset.pattern.permute.xlu2 %v975_v0  ;;  %s392_s12 = scalar_lea.vmem %s1122_s0, %s917_s9  ;;  %s403_s16 = scalar_lea.vmem %s1124_s2, %s1048_s13 }
   0xf   : > { %v435_v1 = vld [vmem:[%s392_s12 + $0x30] sm:$0xff]  ;;  %v436_v2 = vld [vmem:[%s392_s12 + $0x38] sm:$0xff]  ;;  %v433_v3 = vld [vmem:[%s392_s12 + $0x20] sm:$0xff]  ;;  %s1058_s19 = scalar_lea.vmem %s1123_s1, %s1048_s13  ;;  %s427_s26 = scalar_lea.vmem %s1130_s8, %s917_s9  ;;  %569 = vperm.xlu2 %950, %v551_v39  }
  0x10   : > { %490 = vmatpush.msra.mxu0 %v435_v1  ;;  %519 = vmatpush.msra.mxu1 %v436_v2  ;;  %v434_v4 = vld [vmem:[%s392_s12 + $0x28] sm:$0xff]  ;;  %v431_v5 = vld [vmem:[%s392_s12 + $0x10] sm:$0xff]  ;;  %v432_v6 = vld [vmem:[%s392_s12 + $0x18] sm:$0xff]  ;;  %s408_s14 = scalar_lea.vmem %s1125_s3, %s1048_s13  ;;  %s921_s20 = sshll.u32 %s1136_s27, 3 }
  0x11   : > { %v442_v7 = vld [vmem:[%s403_s16 + $0x8] sm:$0xff]  ;;  %v429_v8 = vld [vmem:[%s392_s12] sm:$0xff]  ;;  %v444_v10 = vld [vmem:[%s403_s16 + $0x18] sm:$0xff]  ;;  %s417_s23 = scalar_lea.vmem %s1129_s7, %s921_s20 }
  0x12   : > { %491 = vmatpush.msra.mxu0 %v433_v3  ;;  %520 = vmatpush.msra.mxu1 %v434_v4  ;;  %v430_v9 = vld [vmem:[%s392_s12 + $0x8] sm:$0xff]  ;;  %v437_v11 = vld [vmem:[%s1058_s19] sm:$0xff]  ;;  %v443_v13 = vld [vmem:[%s403_s16 + $0x10] sm:$0xff] }
  0x13   : > { %452 = vperm.xlu1 %949, %v442_v7   ;;  %462 = vperm.xlu0 %948, %v444_v10   ;;  %v441_v12 = vld [vmem:[%s403_s16] sm:$0xff]  ;;  %v438_v14 = vld [vmem:[%s1058_s19 + $0x8] sm:$0xff]  ;;  %v439_v17 = vld [vmem:[%s1058_s19 + $0x10] sm:$0xff] }
  0x14   : > { %492 = vmatpush.msra.mxu0 %v431_v5  ;;  %521 = vmatpush.msra.mxu1 %v432_v6  ;;  %v440_v18 = vld [vmem:[%s1058_s19 + $0x18] sm:$0xff]  ;;  %v544_v40 = vld [vmem:[%s408_s14] sm:$0xff]  ;;  %v545_v42 = vld [vmem:[%s408_s14 + $0x8] sm:$0xff] }
  0x15   : > { %v546_v44 = vld [vmem:[%s408_s14 + $0x10] sm:$0xff]  ;;  %v547_v45 = vld [vmem:[%s408_s14 + $0x18] sm:$0xff]  ;;  %v650_v10 = vld [vmem:[%s1127_s5] sm:$0x7] }
  0x16   : > { %493 = vmatpush.msra.mxu0 %v429_v8  ;;  %522 = vmatpush.msra.mxu1 %v430_v9 }
  0x17   : > { %897 = vmatmul.msk.f32.vlgmr.msra.gmra.mxu0 %vm465_vm0, %v437_v11  ;;  %901 = vmatmul.msk.f32.vlgmr.msra.gmra.mxu1 %vm465_vm0, %v437_v11 }
  0x18   : > { %564 = vperm.xlu2 %950, %v550_v41  }
  0x1b   : > { %447 = vperm.xlu1 %949, %v441_v12   ;;  %457 = vperm.xlu0 %948, %v443_v13  }
  0x1f   : > { %898 = vmatmul.msk.f32.gmra.mxu0 %vm465_vm0, %v438_v14  ;;  %902 = vmatmul.msk.f32.gmra.mxu1 %vm465_vm0, %v438_v14 }
  0x20   : > { %654 = vperm.xlu2 %950, %v651_v43  }
  0x23   : > { %554 = vperm.xlu1 %949, %v548_v15   ;;  %559 = vperm.xlu0 %948, %v549_v16  }
  0x27   : > { %899 = vmatmul.msk.f32.gmra.mxu0 %vm465_vm0, %v439_v17  ;;  %903 = vmatmul.msk.f32.gmra.mxu1 %vm465_vm0, %v439_v17 }
  0x2f   : > { %900 = vmatmul.msk.f32.gmra.mxu0 %vm465_vm0, %v440_v18  ;;  %904 = vmatmul.msk.f32.gmra.mxu1 %vm465_vm0, %v440_v18 }
  0x69   : > { %v570_v50 = vpop.permute.xlu2 %569 }
  0x72   : > { %v565_v53 = vpop.permute.xlu2 %564 }
  0x7a   : > { %v655_v11 = vpop.permute.xlu2 %654 }
  0x85   : > { %v453_v19 = vpop.permute.xlu1 %452  ;;  %v463_v25 = vpop.permute.xlu0 %462 }
  0x8d   : > { %v448_v20 = vpop.permute.xlu1 %447  ;;  %v458_v30 = vpop.permute.xlu0 %457 }
  0x94   : > { %v495_v21 = vpop.f32.mrf.mxu0  ;;  %v524_v22 = vpop.f32.mrf.mxu1 }
  0x95   : > { %v496_v23 = vadd.f32 %v495_v21, %v448_v20  ;;  %v525_v24 = vadd.f32 %v524_v22, %v448_v20  ;;  %v560_v60 = vpop.permute.xlu0 %559  ;;  %v555_v1 = vpop.permute.xlu1 %554 }
  0x97   : > { %536 = vst [vmem:[%s427_s26] sm:$0xff] %v496_v23 }
  0x98   : > { %537 = vst [vmem:[%s427_s26 + $0x8] sm:$0xff] %v525_v24 }
  0x9c   : > { %v498_v26 = vpop.f32.mrf.mxu0  ;;  %v527_v27 = vpop.f32.mrf.mxu1 }
  0x9d   : > { %v499_v28 = vadd.f32 %v498_v26, %v453_v19  ;;  %v528_v29 = vadd.f32 %v527_v27, %v453_v19 }
  0x9f   : > { %538 = vst [vmem:[%s427_s26 + $0x10] sm:$0xff] %v499_v28 }
  0xa0   : > { %539 = vst [vmem:[%s427_s26 + $0x18] sm:$0xff] %v528_v29 }
  0xa4   : > { %v501_v31 = vpop.f32.mrf.mxu0  ;;  %v530_v32 = vpop.f32.mrf.mxu1 }
  0xa5   : > { %v502_v33 = vadd.f32 %v501_v31, %v458_v30  ;;  %v531_v34 = vadd.f32 %v530_v32, %v458_v30 }
  0xa7   : > { %540 = vst [vmem:[%s427_s26 + $0x20] sm:$0xff] %v502_v33 }
  0xa8   : > { %541 = vst [vmem:[%s427_s26 + $0x28] sm:$0xff] %v531_v34 }
  0xac   : > { %v504_v35 = vpop.f32.mrf.mxu0  ;;  %v533_v36 = vpop.f32.mrf.mxu1 }
  0xad   : > { %v505_v37 = vadd.f32 %v504_v35, %v463_v25  ;;  %v534_v38 = vadd.f32 %v533_v36, %v463_v25 }
  0xaf   : > { %542 = vst [vmem:[%s427_s26 + $0x30] sm:$0xff] %v505_v37  ;;  %596 = vmatpush.msra.mxu2 %v505_v37  ;;  %625 = vmatpush.msra.mxu3 %v534_v38 }
  0xb0   : > { %543 = vst [vmem:[%s427_s26 + $0x38] sm:$0xff] %v534_v38 }
  0xb1   : > { %597 = vmatpush.msra.mxu2 %v502_v33  ;;  %626 = vmatpush.msra.mxu3 %v531_v34 }
  0xb3   : > { %598 = vmatpush.msra.mxu2 %v499_v28  ;;  %627 = vmatpush.msra.mxu3 %v528_v29 }
  0xb5   : > { %599 = vmatpush.msra.mxu2 %v496_v23  ;;  %628 = vmatpush.msra.mxu3 %v525_v24 }
  0xb6   : > { %905 = vmatmul.msk.f32.vlgmr.msra.gmra.mxu2 %vm465_vm0, %v544_v40  ;;  %909 = vmatmul.msk.f32.vlgmr.msra.gmra.mxu3 %vm465_vm0, %v544_v40 }
  0xbe   : > { %906 = vmatmul.msk.f32.gmra.mxu2 %vm465_vm0, %v545_v42  ;;  %910 = vmatmul.msk.f32.gmra.mxu3 %vm465_vm0, %v545_v42 }
  0xc6   : > { %907 = vmatmul.msk.f32.gmra.mxu2 %vm465_vm0, %v546_v44  ;;  %911 = vmatmul.msk.f32.gmra.mxu3 %vm465_vm0, %v546_v44 }
  0xce   : > { %908 = vmatmul.msk.f32.gmra.mxu2 %vm465_vm0, %v547_v45  ;;  %912 = vmatmul.msk.f32.gmra.mxu3 %vm465_vm0, %v547_v45 }
 0x139   : > { %v601_v46 = vpop.f32.mrf.mxu2  ;;  %v630_v47 = vpop.f32.mrf.mxu3 }
 0x13a   : > { %v602_v2 = vadd.f32 %v601_v46, %v555_v1  ;;  %v631_v3 = vadd.f32 %v630_v47, %v555_v1 }
 0x13c   : > { %v642_v8 = vmax.f32 %v602_v2, 0.0  ;;  %v643_v9 = vmax.f32 %v631_v3, 0.0 }
 0x141   : > { %v604_v48 = vpop.f32.mrf.mxu2  ;;  %v633_v49 = vpop.f32.mrf.mxu3 }
 0x142   : > { %v605_v61 = vadd.f32 %v604_v48, %v560_v60  ;;  %v634_v62 = vadd.f32 %v633_v49, %v560_v60 }
 0x144   : > { %v644_v6 = vmax.f32 %v605_v61, 0.0  ;;  %v645_v7 = vmax.f32 %v634_v62, 0.0 }
 0x149   : > { %v607_v51 = vpop.f32.mrf.mxu2  ;;  %v636_v52 = vpop.f32.mrf.mxu3 }
 0x14a   : > { %v608_v56 = vadd.f32 %v607_v51, %v565_v53  ;;  %v637_v57 = vadd.f32 %v636_v52, %v565_v53 }
 0x14c   : > { %v646_v4 = vmax.f32 %v608_v56, 0.0  ;;  %v647_v5 = vmax.f32 %v637_v57, 0.0 }
 0x151   : > { %v610_v54 = vpop.f32.mrf.mxu2  ;;  %v639_v55 = vpop.f32.mrf.mxu3 }
 0x152   : > { %v611_v58 = vadd.f32 %v610_v54, %v570_v50  ;;  %v640_v59 = vadd.f32 %v639_v55, %v570_v50 }
 0x154   : > { %v648_v63 = vmax.f32 %v611_v58, 0.0  ;;  %v649_v0 = vmax.f32 %v640_v59, 0.0 }
 0x156   : > { %672 = vmatpush.msrb.mxu0 %v648_v63  ;;  %692 = vmatpush.msrb.mxu1 %v649_v0 }
 0x158   : > { %673 = vmatpush.msrb.mxu0 %v646_v4  ;;  %693 = vmatpush.msrb.mxu1 %v647_v5 }
 0x15a   : > { %674 = vmatpush.msrb.mxu0 %v644_v6  ;;  %694 = vmatpush.msrb.mxu1 %v645_v7 }
 0x15c   : > { %675 = vmatpush.msrb.mxu0 %v642_v8  ;;  %695 = vmatpush.msrb.mxu1 %v643_v9 }
 0x15d   : > { %913 = vmatmul.msk.f32.vlgmr.msrb.gmra.mxu0 %vm465_vm0, %v650_v10  ;;  %914 = vmatmul.msk.f32.vlgmr.msrb.gmra.mxu1 %vm465_vm0, %v650_v10 }
 0x1da   : > { %v677_v12 = vpop.f32.mrf.mxu0  ;;  %v697_v13 = vpop.f32.mrf.mxu1 }
 0x1db   : > { %v698_v14 = vadd.f32 %v697_v13, %v655_v11  ;;  %v678_v15 = vadd.f32 %v677_v12, %v655_v11 }
 0x1dd   : > { %v702_v16 = vrot.slane %v698_v14, 4 }
 0x1df   : > { %v704_v17 = vsel %vm703_vm1, %v678_v15, %v702_v16 }
 0x1e0   : > { %706 = vst [vmem:[%s417_s23] sm:$0x77] %v704_v17 }
 0x1e1 PF: > { %s19_s29 = sadd.s32 1, %s973_s29   ;;  %s1131_s27 = smov %s969_s28 }
 0x1e2   : > { %p16_p5 = scmp.ge.s32.totalorder %s19_s29, 4   ;;  %s1132_s28 = smov %s1134_s30 }
 0x1e4   :  { %18 = sbr.rel (!%p16_p5) target bundleno = 2 (0x2), region = 99 }

</bundles_post_ra>
